<compile_context>
chip_gen: v7x
topology: tpu7x:2x2x1
jax: 0.10.0
libtpu: 0.0.40
codegen_flags: <defaults>
</compile_context>

<pallas_src>
import jax
import jax.numpy as jnp
from jax.experimental import pallas as pl
from jax.experimental.pallas import tpu as pltpu

EPS = 1e-5          # PyTorch BatchNorm1d default eps
H1 = 128            # fc1 output features
H2 = 64             # fc2 output features
H2_PAD = 128        # lane-dense padded fc2 output features


def _round_up(n, m):
    return (n + m - 1) // m * m


# --------------------------------------------------------------------------------------
# Fast path: whole (padded) batch fits in a single tile -> fully fused one-pass kernel.
# --------------------------------------------------------------------------------------
def _make_fused_kernel(batch, b_pad, needs_mask):
    inv_b = 1.0 / batch

    def kernel(x_ref, w1_ref, g1_ref, be1_ref, w2_ref, g2_ref, be2_ref, out_ref):
        # h1 = x @ W1  (fc1 bias omitted: cancelled by training-mode BN mean subtraction).
        h1 = jnp.dot(x_ref[...], w1_ref[...], preferred_element_type=jnp.float32)
        # Padded x rows are exactly zero and there is no bias, so h1 padded rows are
        # exactly zero -> no masking needed for layer-1 statistics.
        mean1 = jnp.sum(h1, axis=0, keepdims=True) * inv_b
        var1 = jnp.sum(h1 * h1, axis=0, keepdims=True) * inv_b - mean1 * mean1
        s1 = g1_ref[...] * jax.lax.rsqrt(var1 + EPS)
        a1 = jnp.maximum(h1 * s1 + (be1_ref[...] - mean1 * s1), 0.0)

        h2 = jnp.dot(a1, w2_ref[...], preferred_element_type=jnp.float32)
        if needs_mask:
            # a1 padded rows = relu(shift1) may be nonzero -> mask layer-2 statistics.
            row = jax.lax.broadcasted_iota(jnp.int32, (b_pad, 1), 0)
            h2m = jnp.where(row < batch, h2, 0.0)
        else:
            h2m = h2
        mean2 = jnp.sum(h2m, axis=0, keepdims=True) * inv_b
        var2 = jnp.sum(h2m * h2m, axis=0, keepdims=True) * inv_b - mean2 * mean2
        s2 = g2_ref[...] * jax.lax.rsqrt(var2 + EPS)
        # Lane-dense (b_pad, 128) store; padded feature columns are exact zeros.
        out_ref[...] = jnp.maximum(h2 * s2 + (be2_ref[...] - mean2 * s2), 0.0)

    return kernel


# --------------------------------------------------------------------------------------
# Multi-tile path: 3-phase grid with persistent VMEM statistics.
# --------------------------------------------------------------------------------------
def _make_phased_kernel(batch, tile_b, needs_mask):
    inv_b = 1.0 / batch

    def kernel(x_ref, w1_ref, g1_ref, be1_ref, w2_ref, g2_ref, be2_ref, out_ref,
               sum1, ssq1, scale1, shift1, sum2, ssq2, scale2, shift2):
        phase = pl.program_id(0)
        tile = pl.program_id(1)
        last_tile = pl.num_programs(1) - 1

        # h1 = x @ W1 (fc1 bias omitted; see header). Padded batch rows are exactly zero.
        h1 = jnp.dot(x_ref[...], w1_ref[...], preferred_element_type=jnp.float32)

        # ---------- phase 0: full-batch statistics of h1 ----------
        @pl.when(phase == 0)
        def _():
            @pl.when(tile == 0)
            def _():
                sum1[...] = jnp.zeros_like(sum1)
                ssq1[...] = jnp.zeros_like(ssq1)

            # No masking needed: padded rows of h1 are exactly zero.
            sum1[...] += jnp.sum(h1, axis=0, keepdims=True)
            ssq1[...] += jnp.sum(h1 * h1, axis=0, keepdims=True)

            @pl.when(tile == last_tile)
            def _():
                mean = sum1[...] * inv_b
                var = ssq1[...] * inv_b - mean * mean          # biased variance
                s = g1_ref[...] * jax.lax.rsqrt(var + EPS)
                scale1[...] = s
                shift1[...] = be1_ref[...] - mean * s

        # ---------- phases 1 & 2: need normalized a1 and h2 ----------
        @pl.when(phase > 0)
        def _():
            a1 = jnp.maximum(h1 * scale1[...] + shift1[...], 0.0)   # bn1 folded FMA + relu
            h2 = jnp.dot(a1, w2_ref[...], preferred_element_type=jnp.float32)

            @pl.when(phase == 1)
            def _():
                @pl.when(tile == 0)
                def _():
                    sum2[...] = jnp.zeros_like(sum2)
                    ssq2[...] = jnp.zeros_like(ssq2)

                if needs_mask:
                    # a1 padded rows = relu(shift1) may be nonzero -> mask h2 stats.
                    row = (jax.lax.broadcasted_iota(jnp.int32, (tile_b, 1), 0)
                           + tile * tile_b)
                    h2m = jnp.where(row < batch, h2, 0.0)
                else:
                    h2m = h2
                sum2[...] += jnp.sum(h2m, axis=0, keepdims=True)
                ssq2[...] += jnp.sum(h2m * h2m, axis=0, keepdims=True)

                @pl.when(tile == last_tile)
                def _():
                    mean = sum2[...] * inv_b
                    var = ssq2[...] * inv_b - mean * mean
                    s = g2_ref[...] * jax.lax.rsqrt(var + EPS)
                    scale2[...] = s
                    shift2[...] = be2_ref[...] - mean * s

            @pl.when(phase == 2)
            def _():
                # Lane-dense (TB, 128) store; padded feature columns are exact zeros.
                out_ref[...] = jnp.maximum(h2 * scale2[...] + shift2[...], 0.0)

    return kernel


def feature_extractor(x, params, *, tile_b=512):
    """x: (B, input_size) float32 -> (B, 64) float32 (training-mode BatchNorm semantics).

    tile_b must be a multiple of 8 (sublane granularity).
    """
    assert tile_b % 8 == 0
    B, d_in = x.shape
    w1, b1, g1, be1, w2, b2, g2, be2 = params
    del b1, b2  # pre-BN linear biases are a no-op under training-mode BatchNorm

    # Lane-dense output: pad fc2 to 128 output features. The padded columns stay exactly
    # zero through the whole pipeline (W2 cols = 0, gamma = 0, beta = 0) and are sliced off.
    w2p = jnp.pad(w2, ((0, 0), (0, H2_PAD - H2)))
    g2p = jnp.pad(g2, ((0, 0), (0, H2_PAD - H2)))
    be2p = jnp.pad(be2, ((0, 0), (0, H2_PAD - H2)))

    # Batch tiling.
    tb = min(tile_b, _round_up(B, 8))
    b_pad = _round_up(B, tb)
    if b_pad != B:
        x = jnp.pad(x, ((0, b_pad - B), (0, 0)))   # padded rows handled inside the kernel
    n_tiles = b_pad // tb
    needs_mask = (b_pad != B)

    if n_tiles == 1:
        # ---------------- fused one-pass fast path ----------------
        kernel = _make_fused_kernel(batch=B, b_pad=b_pad, needs_mask=needs_mask)
        y = pl.pallas_call(
            kernel,
            out_shape=jax.ShapeDtypeStruct((b_pad, H2_PAD), jnp.float32),
        )(x, w1, g1, be1, w2p, g2p, be2p)
        return y[:B, :H2]

    # ---------------- multi-tile 3-phase path ----------------
    kernel = _make_phased_kernel(batch=B, tile_b=tb, needs_mask=needs_mask)

    const = lambda shape: pl.BlockSpec(shape, lambda p, t: (0, 0))   # resident params
    stat = lambda: pltpu.VMEM((1, H2_PAD), jnp.float32)              # H1 == H2_PAD == 128

    y = pl.pallas_call(
        kernel,
        out_shape=jax.ShapeDtypeStruct((b_pad, H2_PAD), jnp.float32),
        grid=(3, n_tiles),                                  # (phase, batch tile)
        in_specs=[
            pl.BlockSpec((tb, d_in), lambda p, t: (t, 0)),  # x tile (re-read each phase)
            const((d_in, H1)),                              # W1
            const((1, H1)),                                 # gamma1
            const((1, H1)),                                 # beta1
            const((H1, H2_PAD)),                            # W2 (padded)
            const((1, H2_PAD)),                             # gamma2 (padded)
            const((1, H2_PAD)),                             # beta2 (padded)
        ],
        # Output block index only advances in the final phase -> each block is DMA'd
        # back to HBM exactly once, with the finalized data.
        out_specs=pl.BlockSpec((tb, H2_PAD),
                               lambda p, t: (jnp.where(p == 2, t, 0), 0)),
        scratch_shapes=[stat() for _ in range(8)],          # sum/sumsq/scale/shift x2 layers
        compiler_params=pltpu.CompilerParams(
            # Cross-tile stat accumulation + phase ordering require sequential execution.
            dimension_semantics=("arbitrary", "arbitrary"),
        ),
    )(x, w1, g1, be1, w2p, g2p, be2p)

    return y[:B, :H2]


def init_params(key, input_size):
    """Deterministic synthetic parameters matching the PyTorch module's shapes."""
    ks = jax.random.split(key, 8)
    bound1 = 1.0 / jnp.sqrt(input_size)
    bound2 = 1.0 / jnp.sqrt(128.0)
    w1 = jax.random.uniform(ks[0], (input_size, 128), jnp.float32, -bound1, bound1)
    b1 = jax.random.uniform(ks[1], (1, 128), jnp.float32, -bound1, bound1)
    g1 = jnp.ones((1, 128), jnp.float32) + 0.1 * jax.random.normal(ks[2], (1, 128), jnp.float32)
    be1 = 0.1 * jax.random.normal(ks[3], (1, 128), jnp.float32)
    w2 = jax.random.uniform(ks[4], (128, 64), jnp.float32, -bound2, bound2)
    b2 = jax.random.uniform(ks[5], (1, 64), jnp.float32, -bound2, bound2)
    g2 = jnp.ones((1, 64), jnp.float32) + 0.1 * jax.random.normal(ks[6], (1, 64), jnp.float32)
    be2 = 0.1 * jax.random.normal(ks[7], (1, 64), jnp.float32)
    return (w1, b1, g1, be1, w2, b2, g2, be2)


def reference(x, params):
    """Pure-JAX reference (includes the biases, training-mode BN — mirrors PyTorch)."""
    w1, b1, g1, be1, w2, b2, g2, be2 = params
    h = x @ w1 + b1
    m, v = jnp.mean(h, 0, keepdims=True), jnp.var(h, 0, keepdims=True)
    h = jnp.maximum((h - m) / jnp.sqrt(v + EPS) * g1 + be1, 0.0)
    h2 = h @ w2 + b2
    m2, v2 = jnp.mean(h2, 0, keepdims=True), jnp.var(h2, 0, keepdims=True)
    return jnp.maximum((h2 - m2) / jnp.sqrt(v2 + EPS) * g2 + be2, 0.0)


# TODO(synk): running_mean / running_var buffer updates (training side effect of
# nn.BatchNorm1d) are not produced; only the forward output is computed.

if __name__ == "__main__":
    key = jax.random.PRNGKey(0)
    k_x, k_p, k_x2 = jax.random.split(key, 3)

    batch, input_size = 8, 32
    x = jax.random.normal(k_x, (batch, input_size), jnp.float32)
    params = init_params(k_p, input_size)

    # Single-tile fused fast path.
    out = jax.block_until_ready(feature_extractor(x, params))
    ref = reference(x, params)
    assert out.shape == (batch, 64)
    assert jnp.allclose(out, ref, atol=2e-4, rtol=2e-4), float(jnp.max(jnp.abs(out - ref)))

    # Multi-tile / ragged-batch path: exercises cross-tile stat accumulation + row masking.
    batch2 = 200
    x2 = jax.random.normal(k_x2, (batch2, input_size), jnp.float32)
    out2 = jax.block_until_ready(feature_extractor(x2, params, tile_b=128))
    ref2 = reference(x2, params)
    assert out2.shape == (batch2, 64)
    assert jnp.allclose(out2, ref2, atol=2e-4, rtol=2e-4), float(jnp.max(jnp.abs(out2 - ref2)))

    print("KERNEL_OK")
</pallas_src>

<mosaic_0001>
module attributes {stable_mosaic.version = 11 : i64} {
  func.func @kernel(%arg0: memref<8x32xf32, #tpu.memory_space<vmem>>, %arg1: memref<32x128xf32, #tpu.memory_space<vmem>>, %arg2: memref<1x128xf32, #tpu.memory_space<vmem>>, %arg3: memref<1x128xf32, #tpu.memory_space<vmem>>, %arg4: memref<128x128xf32, #tpu.memory_space<vmem>>, %arg5: memref<1x128xf32, #tpu.memory_space<vmem>>, %arg6: memref<1x128xf32, #tpu.memory_space<vmem>>, %arg7: memref<8x128xf32, #tpu.memory_space<vmem>>) attributes {dimension_semantics = [], scalar_prefetch = 0 : i64, scratch_operands = 0 : i64, tpu.core_type = #tpu.core_type<tc>} {
    %c0 = arith.constant 0 : index
    %c0_0 = arith.constant 0 : index
    %0 = vector.load %arg0[%c0, %c0_0] : memref<8x32xf32, #tpu.memory_space<vmem>>, vector<8x32xf32>
    %c0_1 = arith.constant 0 : index
    %c0_2 = arith.constant 0 : index
    %1 = vector.load %arg1[%c0_1, %c0_2] : memref<32x128xf32, #tpu.memory_space<vmem>>, vector<32x128xf32>
    %cst = arith.constant dense<0.000000e+00> : vector<8x128xf32>
    %2 = tpu.matmul %0, %1, %cst {dimension_numbers = #tpu.dot_dimension_numbers<[1], [0], [0], [1], [0, 0, 1, 1], [], []>} : vector<8x32xf32>, vector<32x128xf32>, vector<8x128xf32> -> vector<8x128xf32>
    %cst_3 = arith.constant dense<0.000000e+00> : vector<128xf32>
    %3 = vector.multi_reduction <add>, %2, %cst_3 [0] : vector<8x128xf32> to vector<128xf32>
    %4 = vector.shape_cast %3 : vector<128xf32> to vector<1x128xf32>
    %cst_4 = arith.constant 1.250000e-01 : f32
    %5 = vector.broadcast %cst_4 : f32 to vector<1x128xf32>
    %6 = arith.mulf %4, %5 : vector<1x128xf32>
    %7 = arith.mulf %2, %2 : vector<8x128xf32>
    %cst_5 = arith.constant dense<0.000000e+00> : vector<128xf32>
    %8 = vector.multi_reduction <add>, %7, %cst_5 [0] : vector<8x128xf32> to vector<128xf32>
    %9 = vector.shape_cast %8 : vector<128xf32> to vector<1x128xf32>
    %cst_6 = arith.constant 1.250000e-01 : f32
    %10 = vector.broadcast %cst_6 : f32 to vector<1x128xf32>
    %11 = arith.mulf %9, %10 : vector<1x128xf32>
    %12 = arith.mulf %6, %6 : vector<1x128xf32>
    %13 = arith.subf %11, %12 : vector<1x128xf32>
    %c0_7 = arith.constant 0 : index
    %c0_8 = arith.constant 0 : index
    %14 = vector.load %arg2[%c0_7, %c0_8] : memref<1x128xf32, #tpu.memory_space<vmem>>, vector<1x128xf32>
    %cst_9 = arith.constant 9.99999974E-6 : f32
    %15 = vector.broadcast %cst_9 : f32 to vector<1x128xf32>
    %16 = arith.addf %13, %15 : vector<1x128xf32>
    %17 = math.rsqrt %16 : vector<1x128xf32>
    %18 = arith.mulf %14, %17 : vector<1x128xf32>
    %19 = vector.broadcast %18 : vector<1x128xf32> to vector<8x128xf32>
    %20 = arith.mulf %2, %19 : vector<8x128xf32>
    %c0_10 = arith.constant 0 : index
    %c0_11 = arith.constant 0 : index
    %21 = vector.load %arg3[%c0_10, %c0_11] : memref<1x128xf32, #tpu.memory_space<vmem>>, vector<1x128xf32>
    %22 = arith.mulf %6, %18 : vector<1x128xf32>
    %23 = arith.subf %21, %22 : vector<1x128xf32>
    %24 = vector.broadcast %23 : vector<1x128xf32> to vector<8x128xf32>
    %25 = arith.addf %20, %24 : vector<8x128xf32>
    %cst_12 = arith.constant 0.000000e+00 : f32
    %26 = vector.broadcast %cst_12 : f32 to vector<8x128xf32>
    %27 = arith.maximumf %25, %26 : vector<8x128xf32>
    %c0_13 = arith.constant 0 : index
    %c0_14 = arith.constant 0 : index
    %28 = vector.load %arg4[%c0_13, %c0_14] : memref<128x128xf32, #tpu.memory_space<vmem>>, vector<128x128xf32>
    %cst_15 = arith.constant dense<0.000000e+00> : vector<8x128xf32>
    %29 = tpu.matmul %27, %28, %cst_15 {dimension_numbers = #tpu.dot_dimension_numbers<[1], [0], [0], [1], [0, 0, 1, 1], [], []>} : vector<8x128xf32>, vector<128x128xf32>, vector<8x128xf32> -> vector<8x128xf32>
    %cst_16 = arith.constant dense<0.000000e+00> : vector<128xf32>
    %30 = vector.multi_reduction <add>, %29, %cst_16 [0] : vector<8x128xf32> to vector<128xf32>
    %31 = vector.shape_cast %30 : vector<128xf32> to vector<1x128xf32>
    %cst_17 = arith.constant 1.250000e-01 : f32
    %32 = vector.broadcast %cst_17 : f32 to vector<1x128xf32>
    %33 = arith.mulf %31, %32 : vector<1x128xf32>
    %34 = arith.mulf %29, %29 : vector<8x128xf32>
    %cst_18 = arith.constant dense<0.000000e+00> : vector<128xf32>
    %35 = vector.multi_reduction <add>, %34, %cst_18 [0] : vector<8x128xf32> to vector<128xf32>
    %36 = vector.shape_cast %35 : vector<128xf32> to vector<1x128xf32>
    %cst_19 = arith.constant 1.250000e-01 : f32
    %37 = vector.broadcast %cst_19 : f32 to vector<1x128xf32>
    %38 = arith.mulf %36, %37 : vector<1x128xf32>
    %39 = arith.mulf %33, %33 : vector<1x128xf32>
    %40 = arith.subf %38, %39 : vector<1x128xf32>
    %c0_20 = arith.constant 0 : index
    %c0_21 = arith.constant 0 : index
    %41 = vector.load %arg5[%c0_20, %c0_21] : memref<1x128xf32, #tpu.memory_space<vmem>>, vector<1x128xf32>
    %cst_22 = arith.constant 9.99999974E-6 : f32
    %42 = vector.broadcast %cst_22 : f32 to vector<1x128xf32>
    %43 = arith.addf %40, %42 : vector<1x128xf32>
    %44 = math.rsqrt %43 : vector<1x128xf32>
    %45 = arith.mulf %41, %44 : vector<1x128xf32>
    %46 = vector.broadcast %45 : vector<1x128xf32> to vector<8x128xf32>
    %47 = arith.mulf %29, %46 : vector<8x128xf32>
    %c0_23 = arith.constant 0 : index
    %c0_24 = arith.constant 0 : index
    %48 = vector.load %arg6[%c0_23, %c0_24] : memref<1x128xf32, #tpu.memory_space<vmem>>, vector<1x128xf32>
    %49 = arith.mulf %33, %45 : vector<1x128xf32>
    %50 = arith.subf %48, %49 : vector<1x128xf32>
    %51 = vector.broadcast %50 : vector<1x128xf32> to vector<8x128xf32>
    %52 = arith.addf %47, %51 : vector<8x128xf32>
    %cst_25 = arith.constant 0.000000e+00 : f32
    %53 = vector.broadcast %cst_25 : f32 to vector<8x128xf32>
    %54 = arith.maximumf %52, %53 : vector<8x128xf32>
    %c0_26 = arith.constant 0 : index
    %c0_27 = arith.constant 0 : index
    %55 = vector.load %arg7[%c0_26, %c0_27] : memref<8x128xf32, #tpu.memory_space<vmem>>, vector<8x128xf32>
    tpu.vector_store %arg7[%c0_26, %c0_27], %54 {strides = array<i32>} : memref<8x128xf32, #tpu.memory_space<vmem>>, vector<8x128xf32>,
    return
  }
}

</mosaic_0001>

<bundles_post_ra>
// kernel: tpu_custom_call.1
= control target key start
LH: loop header
LB: loop body
LE: loop exit
PB: predicated region body
PF: predicated region fallthrough
CT: control target
= control target key end

     0   :  { %12 = vsyncpa [#allocation3], 0  ;;  %s647_s0 = inlined_call_operand.hbm [shape: f32[8,32], index: 0, kind: input, shape index: {}]   ;;  %s648_s1 = inlined_call_operand.hbm [shape: f32[32,128], index: 1, kind: input, shape index: {}]   ;;  %s649_s2 = inlined_call_operand.vmem [shape: f32[1,128], index: 2, kind: input, shape index: {}]   ;;  %s650_s3 = inlined_call_operand.vmem [shape: f32[1,128], index: 3, kind: input, shape index: {}]   ;;  %s651_s4 = inlined_call_operand.hbm [shape: f32[128,128], index: 4, kind: input, shape index: {}]   ;;  %s652_s5 = inlined_call_operand.vmem [shape: f32[1,128], index: 5, kind: input, shape index: {}]   ;;  %s653_s6 = inlined_call_operand.vmem [shape: f32[1,128], index: 6, kind: input, shape index: {}]   ;;  %s654_s7 = inlined_call_operand.hbm [shape: f32[8,128], index: 7, kind: output, shape index: {}]  }
   0x1   :  { %13 = vsyncpa [#allocation6], 0 }
   0x2   :  { %14 = vsyncpa [#allocation4], 0  ;;  %s532_s24 = smov [#allocation5]   ;;  %s438_s28 = scalar_lea.hbm %s648_s1, 512 }
   0x3   :  { %s30_s25 = sshll.u32 %s532_s24, 4  ;;  %p439_p0 = scmp.ne.s32.totalorder %s648_s1, %s438_s28  ;;  %s31_s25 = int_to_ptr.vmem [resolvable:$true] %s30_s25 }
   0x4   :  { %p442_p1 = scmp.lt.u32.totalorder %s438_s28, %s648_s1 }
   0x6   :  { %p444_p2 = pnand %p442_p1, %p439_p0 }
   0x8   :  { %447 = shalt.err (!%p444_p2)
}
   0x9   :  { %s448_s10 = scalar_lea.vmem %s31_s25, 512  ;;  %p453_p4 = scmp.lt.s32.totalorder %s31_s25, %s31_s25 }
   0xa   :  { %p449_p3 = scmp.ne.s32.totalorder %s31_s25, %s448_s10  ;;  %p454_p5 = scmp.lt.s32.totalorder %s448_s10, %s448_s10 }
   0xc   :  { %p455_p6 = por %p454_p5, %p453_p4 }
   0xe   :  { %p456_p7 = pnand %p455_p6, %p449_p3 }
  0x10   :  { %459 = shalt.err (!%p456_p7)
}
  0x11   :  { %s533_s11 = smov 128   ;;  %s534_s12 = smov 8  }
  0x12   :  { %36 = dma.hbm_to_vmem [thread:$0]  %s648_s1, 512, %s31_s25, [#allocation6], %s533_s11, %s533_s11, %s534_s12  }
  0x13   :  { %s535_s15 = smov [#allocation2]   ;;  %s536_s17 = smov [#allocation7]  }
  0x14   :  { %s21_s16 = sshll.u32 %s535_s15, 4  ;;  %s46_s18 = sshll.u32 %s536_s17, 4  ;;  %s22_s16 = int_to_ptr.vmem [resolvable:$true] %s21_s16  ;;  %s47_s18 = int_to_ptr.vmem [resolvable:$true] %s46_s18 }
  0x15   :  { %s460_s21 = scalar_lea.hbm %s647_s0, 128 }
  0x16   :  { %p461_p8 = scmp.ne.s32.totalorder %s647_s0, %s460_s21  ;;  %p464_p9 = scmp.lt.u32.totalorder %s460_s21, %s647_s0 }
  0x18   :  { %p466_p10 = pnand %p464_p9, %p461_p8 }
  0x1a   :  { %469 = shalt.err (!%p466_p10)
}
  0x1b   :  { %s470_s1 = scalar_lea.vmem %s22_s16, 128  ;;  %p475_p12 = scmp.lt.s32.totalorder %s22_s16, %s22_s16 }
  0x1c   :  { %p471_p11 = scmp.ne.s32.totalorder %s22_s16, %s470_s1  ;;  %p476_p13 = scmp.lt.s32.totalorder %s470_s1, %s470_s1 }
  0x1e   :  { %p477_p0 = por %p476_p13, %p475_p12 }
  0x20   :  { %p478_p1 = pnand %p477_p0, %p471_p11 }
  0x22   :  { %481 = shalt.err (!%p478_p1)
}
  0x23   :  { %24 = dma.hbm_to_vmem [thread:$0]  %s647_s0, 128, %s22_s16, [#allocation3]  }
  0x24   :  { %s482_s30 = scalar_lea.hbm %s651_s4, 2048 }
  0x25   :  { %p483_p2 = scmp.ne.s32.totalorder %s651_s4, %s482_s30  ;;  %p486_p3 = scmp.lt.u32.totalorder %s482_s30, %s651_s4 }
  0x27   :  { %p488_p4 = pnand %p486_p3, %p483_p2 }
  0x29   :  { %491 = shalt.err (!%p488_p4)
}
  0x2a   :  { %s492_s14 = scalar_lea.vmem %s47_s18, 2048  ;;  %p497_p6 = scmp.lt.s32.totalorder %s47_s18, %s47_s18 }
  0x2b   :  { %p493_p5 = scmp.ne.s32.totalorder %s47_s18, %s492_s14  ;;  %p498_p7 = scmp.lt.s32.totalorder %s492_s14, %s492_s14 }
  0x2d   :  { %p499_p8 = por %p498_p7, %p497_p6 }
  0x2f   :  { %p500_p9 = pnand %p499_p8, %p493_p5 }
  0x31   :  { %503 = shalt.err (!%p500_p9)
}
  0x32   :  { %52 = dma.hbm_to_vmem [thread:$0]  %s651_s4, 2048, %s47_s18, [#allocation6], %s533_s11, %s533_s11, %s534_s12  }
  0x33   :  { %526 = dma.done.wait [#allocation3], 128  }
  0x34   :  { %527 = vsyncadd [#allocation3], 4294967168 }
  0x35   :  { %528 = dma.done.wait [#allocation6], 2560  }
  0x36   :  { %529 = vsyncadd [#allocation6], 4294964736  ;;  %v537_v0 = vmov 0.0|0.0   ;;  %vm538_vm0 = vmmov 0   ;;  %v539_v1 = vmov 0.0   ;;  %v67_v2 = vld [vmem:[#allocation5] sm:$0xff]  ;;  %v167_v53 = vlaneseq }
  0x37   :  { %395 = vmatprep.subr.bf16.mxu0 %v537_v0  ;;  %357 = vmatprep.mubr.msk.f32.mxu0 %vm538_vm0, %v539_v1  ;;  %v68_v3 = vld [vmem:[#allocation5 + $0x8] sm:$0xff]  ;;  %v69_v4 = vld [vmem:[#allocation5 + $0x10] sm:$0xff]  ;;  %v70_v6 = vld [vmem:[#allocation5 + $0x18] sm:$0xff]  ;;  %vm71_vm1 = vcmask 261120   ;;  %s540_s19 = smov [#allocation8]  }
  0x38   :  { %401 = vmatprep.subr.bf16.mxu1 %v537_v0  ;;  %392 = vmatprep.mubr.msk.f32.mxu1 %vm538_vm0, %v539_v1  ;;  %v396_v5 = vpack.c.bf16 %v68_v3, %v67_v2  ;;  %v399_v7 = vpack.c.bf16 %v70_v6, %v69_v4  ;;  %v66_v8 = vld [vmem:[#allocation2] sm:$0xff]  ;;  %v184_v9 = vld [vmem:[#allocation7] sm:$0xff]  ;;  %v185_v10 = vld [vmem:[#allocation7 + $0x8] sm:$0xff]  ;;  %v168_v54 = vshrl.u32 %v167_v53, 7  ;;  %s316_s20 = sshll.u32 %s540_s19, 4  ;;  %s317_s20 = int_to_ptr.vmem [resolvable:$true] %s316_s20 }
  0x39   :  { %v402_v11 = vpack.c.bf16 %v185_v10, %v184_v9  ;;  %v186_v12 = vld [vmem:[#allocation7 + $0x10] sm:$0xff]  ;;  %v187_v13 = vld [vmem:[#allocation7 + $0x18] sm:$0xff]  ;;  %v188_v15 = vld [vmem:[#allocation7 + $0x20] sm:$0xff]  ;;  %s504_s21 = scalar_lea.vmem %s317_s20, 128  ;;  %p509_p11 = scmp.lt.s32.totalorder %s317_s20, %s317_s20 }
  0x3a   :  { %397 = vmatpush3.bf16.msra.mxu0 %v396_v5  ;;  %v405_v14 = vpack.c.bf16 %v187_v13, %v186_v12  ;;  %v189_v16 = vld [vmem:[#allocation7 + $0x28] sm:$0xff]  ;;  %v190_v18 = vld [vmem:[#allocation7 + $0x30] sm:$0xff]  ;;  %v191_v19 = vld [vmem:[#allocation7 + $0x38] sm:$0xff]  ;;  %v169_v56 = vsub.s32 0, %v168_v54  ;;  %p505_p10 = scmp.ne.s32.totalorder %s317_s20, %s504_s21  ;;  %p510_p12 = scmp.lt.s32.totalorder %s504_s21, %s504_s21 }
  0x3b   :  { %398 = vmatprep.subr.bf16.mxu0 %v537_v0  ;;  %403 = vmatpush3.bf16.msra.mxu1 %v402_v11  ;;  %v408_v17 = vpack.c.bf16 %v189_v16, %v188_v15  ;;  %v411_v20 = vpack.c.bf16 %v191_v19, %v190_v18  ;;  %v192_v21 = vld [vmem:[#allocation7 + $0x40] sm:$0xff]  ;;  %v193_v22 = vld [vmem:[#allocation7 + $0x48] sm:$0xff]  ;;  %v194_v24 = vld [vmem:[#allocation7 + $0x50] sm:$0xff] }
  0x3c   :  { %404 = vmatprep.subr.bf16.mxu1 %v537_v0  ;;  %v414_v23 = vpack.c.bf16 %v193_v22, %v192_v21  ;;  %v195_v25 = vld [vmem:[#allocation7 + $0x58] sm:$0xff]  ;;  %v196_v27 = vld [vmem:[#allocation7 + $0x60] sm:$0xff]  ;;  %v197_v28 = vld [vmem:[#allocation7 + $0x68] sm:$0xff]  ;;  %p511_p13 = por %p510_p12, %p509_p11 }
  0x3d   :  { %v417_v26 = vpack.c.bf16 %v195_v25, %v194_v24  ;;  %v420_v29 = vpack.c.bf16 %v197_v28, %v196_v27  ;;  %v198_v30 = vld [vmem:[#allocation7 + $0x70] sm:$0xff]  ;;  %v199_v31 = vld [vmem:[#allocation7 + $0x78] sm:$0xff] }
  0x3e   :  { %400 = vmatpush3.bf16.msra.mxu0 %v399_v7  ;;  %v423_v32 = vpack.c.bf16 %v199_v31, %v198_v30  ;;  %v162_v55 = vld [vmem:[%s649_s2] sm:$0x1]  ;;  %p512_p0 = pnand %p511_p13, %p505_p10 }
  0x3f   :  { %406 = vmatpush3.bf16.msra.mxu1 %v405_v14  ;;  %v173_v59 = vld [vmem:[%s650_s3] sm:$0x1] }
  0x40   :  { %407 = vmatprep.subr.bf16.mxu1 %v537_v0 }
  0x41   :  { %358 = vmatmul.mubr.msk.f32.vlgmr.msra.gmra.mrb[0].mxu0 %vm71_vm1, %v66_v8 }
  0x43   :  { %409 = vmatpush3.bf16.msra.mxu1 %v408_v17 }
  0x44   :  { %410 = vmatprep.subr.bf16.mxu1 %v537_v0 }
  0x47   :  { %412 = vmatpush3.bf16.msra.mxu1 %v411_v20 }
  0x48   :  { %413 = vmatprep.subr.bf16.mxu1 %v537_v0 }
  0x4b   :  { %415 = vmatpush3.bf16.msra.mxu1 %v414_v23  ;;  %v287_v23 = vld [vmem:[%s652_s5] sm:$0x1] }
  0x4c   :  { %416 = vmatprep.subr.bf16.mxu1 %v537_v0 }
  0x4f   :  { %418 = vmatpush3.bf16.msra.mxu1 %v417_v26  ;;  %v298_v26 = vld [vmem:[%s653_s6] sm:$0x1] }
  0x50   :  { %419 = vmatprep.subr.bf16.mxu1 %v537_v0 }
  0x53   :  { %421 = vmatpush3.bf16.msra.mxu1 %v420_v29 }
  0x54   :  { %422 = vmatprep.subr.bf16.mxu1 %v537_v0 }
  0x57   :  { %424 = vmatpush3.bf16.msra.mxu1 %v423_v32 }
 0x114   :  { %v141_v33 = vpop.f32.mrb[0].mxu0 }
 0x115   :  { %v145_v34 = vrot.slane %v141_v33, 4  ;;  %v152_v35 = vmul.f32 %v141_v33, %v141_v33  ;;  %v359_v36 = vpop.f32.mrb[1].mxu0 }
 0x117   :  { %v146_v37 = vadd.f32 %v145_v34, %v141_v33  ;;  %v153_v38 = vrot.slane %v152_v35, 4 }
 0x119   :  { %v147_v39 = vrot.slane %v146_v37, 2  ;;  %v154_v40 = vadd.f32 %v153_v38, %v152_v35 }
 0x11b   :  { %v148_v41 = vadd.f32 %v147_v39, %v146_v37  ;;  %v155_v42 = vrot.slane %v154_v40, 2 }
 0x11d   :  { %v149_v43 = vrot.slane %v148_v41, 1  ;;  %v156_v44 = vadd.f32 %v155_v42, %v154_v40 }
 0x11f   :  { %v150_v45 = vadd.f32 %v149_v43, %v148_v41  ;;  %v157_v46 = vrot.slane %v156_v44, 1 }
 0x121   :  { %v151_v47 = vmul.f32 0.125, %v150_v45  ;;  %v158_v48 = vadd.f32 %v157_v46, %v156_v44 }
 0x123   :  { %v159_v49 = vmul.f32 0.125, %v158_v48  ;;  %v160_v50 = vmul.f32 %v151_v47, %v151_v47 }
 0x125   :  { %v161_v51 = vsub.f32 %v159_v49, %v160_v50 }
 0x127   :  { %v163_v52 = vadd.f32 1e-05, %v161_v51 }
 0x129   :  { %434 = vrsqrt.f32 %v163_v52 }
 0x133   :  { %v435_v57 = vpop.eup %434 }
 0x134   :  { %v165_v58 = vmul.f32 %v435_v57, %v162_v55 }
 0x136   :  { %v170_v60 = vrot.slane %v165_v58, %v169_v56  ;;  %v174_v61 = vmul.f32 %v165_v58, %v151_v47 }
 0x138   :  { %v175_v62 = vsub.f32 %v173_v59, %v174_v61  ;;  %v172_v63 = vmul.f32 %v170_v60, %v141_v33 }
 0x13a   :  { %v180_v0 = vrot.slane %v175_v62, %v169_v56 }
 0x13c   :  { %v182_v1 = vadd.f32 %v180_v0, %v172_v63 }
 0x13e   :  { %v183_v2 = vmax.f32 %v182_v1, 0.0 }
 0x140   :  { %393 = vmatmul.mubr.f32.vlgmr.msra.gmra.mrb[0].mxu1 %v183_v2 }
 0x213   :  { %v266_v3 = vpop.f32.mrb[0].mxu1 }
 0x214   :  { %v270_v4 = vrot.slane %v266_v3, 4  ;;  %v277_v5 = vmul.f32 %v266_v3, %v266_v3  ;;  %v394_v6 = vpop.f32.mrb[1].mxu1 }
 0x216   :  { %v271_v7 = vadd.f32 %v270_v4, %v266_v3  ;;  %v278_v8 = vrot.slane %v277_v5, 4 }
 0x218   :  { %v272_v9 = vrot.slane %v271_v7, 2  ;;  %v279_v10 = vadd.f32 %v278_v8, %v277_v5 }
 0x21a   :  { %v273_v11 = vadd.f32 %v272_v9, %v271_v7  ;;  %v280_v12 = vrot.slane %v279_v10, 2 }
 0x21c   :  { %v274_v13 = vrot.slane %v273_v11, 1  ;;  %v281_v14 = vadd.f32 %v280_v12, %v279_v10 }
 0x21e   :  { %v275_v15 = vadd.f32 %v274_v13, %v273_v11  ;;  %v282_v16 = vrot.slane %v281_v14, 1 }
 0x220   :  { %v276_v17 = vmul.f32 0.125, %v275_v15  ;;  %v283_v18 = vadd.f32 %v282_v16, %v281_v14 }
 0x222   :  { %v284_v19 = vmul.f32 0.125, %v283_v18  ;;  %v285_v20 = vmul.f32 %v276_v17, %v276_v17 }
 0x224   :  { %v286_v21 = vsub.f32 %v284_v19, %v285_v20 }
 0x226   :  { %v288_v22 = vadd.f32 1e-05, %v286_v21 }
 0x228   :  { %436 = vrsqrt.f32 %v288_v22 }
 0x232   :  { %v437_v24 = vpop.eup %436 }
 0x233   :  { %v290_v25 = vmul.f32 %v437_v24, %v287_v23 }
 0x235   :  { %v295_v27 = vrot.slane %v290_v25, %v169_v56  ;;  %v299_v28 = vmul.f32 %v290_v25, %v276_v17 }
 0x237   :  { %v300_v29 = vsub.f32 %v298_v26, %v299_v28  ;;  %v297_v30 = vmul.f32 %v295_v27, %v266_v3 }
 0x239   :  { %v305_v31 = vrot.slane %v300_v29, %v169_v56 }
 0x23b   :  { %v307_v32 = vadd.f32 %v305_v31, %v297_v30 }
 0x23d   :  { %v308_v33 = vmax.f32 %v307_v32, 0.0 }
 0x23f   :  { %309 = vst [vmem:[#allocation8] sm:$0xff] %v308_v33 }
 0x240   :  { %515 = shalt.err (!%p512_p0)
}
 0x241   :  { %s516_s22 = scalar_lea.hbm %s654_s7, 128 }
 0x242   :  { %p517_p1 = scmp.ne.s32.totalorder %s654_s7, %s516_s22  ;;  %p520_p2 = scmp.lt.u32.totalorder %s516_s22, %s654_s7 }
 0x244   :  { %p522_p3 = pnand %p520_p2, %p517_p1 }
 0x246   :  { %525 = shalt.err (!%p522_p3)
}
 0x247   :  { %319 = dma.vmem_to_hbm [thread:$0]  %s317_s20, 128, %s654_s7, [#allocation4]  }
 0x248   :  { %530 = dma.done.wait [#allocation4], 128  }
 0x249   :  { %531 = vsyncadd [#allocation4], 4294967168 }
 0x24a   :  { %323 = vsyncpa [#allocation3], 1 }
 0x24b   :  { %324 = vsyncpa [#allocation6], 1 }
 0x24c   :  { %325 = vsyncpa [#allocation4], 1 }

</bundles_post_ra>
